<compile_context>
chip_gen: v7x
topology: tpu7x:2x2x1
jax: 0.10.0
libtpu: 0.0.40
codegen_flags: <defaults>
</compile_context>

<pallas_src>
import functools

import numpy as np
import jax
import jax.numpy as jnp
from jax import lax
from jax.experimental import pallas as pl
from jax.experimental.pallas import tpu as pltpu


def _round_up(x, m):
    return ((x + m - 1) // m) * m


# ---------------------------------------------------------------------------
# Chip introspection (VMEM capacity, megacore) with conservative fallbacks.
# ---------------------------------------------------------------------------
def _tpu_chip_info():
    vmem_cap = None
    try:
        vmem_cap = int(pltpu.get_tpu_info().vmem_capacity_bytes)
    except Exception:
        vmem_cap = None
    kind = ""
    try:
        kind = jax.devices()[0].device_kind.lower()
    except Exception:
        pass
    is_v7 = ("v7" in kind) or ("7x" in kind)
    if vmem_cap is None:
        # v7x has 64 MiB VMEM per TensorCore; v4/v5e/v6e have 128 MiB.
        vmem_cap = (64 << 20) if is_v7 else (128 << 20)
    # Chips with 2 TensorCores per chip (megacore grid sharding).
    two_cores = is_v7 or ("v4" in kind) or ("v5p" in kind)
    return vmem_cap, two_cores


# ---------------------------------------------------------------------------
# Pallas kernel: one (row-tile, col-tile) of (A @ W + bias)
#   a_ref: [tm, Kp] (bf16/f32)   w_ref: [Kp, tn]   b_ref: [1, tn] f32
#   o_ref: [tm, tn]
# Full Kp per block -> a single MXU matmul + f32 bias epilogue, no K loop.
# ---------------------------------------------------------------------------
def _matmul_bias_kernel(a_ref, w_ref, b_ref, o_ref):
    acc = jnp.dot(a_ref[...], w_ref[...], preferred_element_type=jnp.float32)
    o_ref[...] = (acc + b_ref[...]).astype(o_ref.dtype)


def _choose_tiles(M, Kp, Np, a_itemsize, w_itemsize, out_itemsize, m_align,
                  vmem_cap, two_cores):
    """Pick (tm, tn): biggest row tile that fits a chip-appropriate VMEM budget."""
    # N tile: keep output stores lane-dense; only tile N for wide embeddings so
    # the f32 out tile does not force tm down.
    if Np > 1024 and Np % 512 == 0:
        tn = 512
    elif Np > 1024 and Np % 256 == 0:
        tn = 256
    else:
        tn = Np

    # 40 MiB budget on v7x (64 MiB/TC); generous 88 MiB on 128-MiB parts so tm
    # stays big and per-step (~0.35 us) pipeline overhead amortizes.
    budget = (40 << 20) if vmem_cap <= (64 << 20) else (88 << 20)

    m_cap = _round_up(M, m_align)
    # Split M only on megacore chips, and only when each half still feeds the
    # 256-wide v7x MXU; single-TC chips (v5e/v6e) take the whole M in one tile.
    if two_cores and M >= 512:
        m_cap = min(m_cap, _round_up((M + 1) // 2, 256))

    w_bufs = 1 if tn == Np else 2           # constant weight -> single buffer
    fixed = w_bufs * (Kp * tn * w_itemsize + tn * 4)
    for cand in (1024, 512, 256, 128, 64, 32, 16, 8):
        if cand < m_align:
            continue
        tm = _round_up(min(cand, m_cap), m_align)
        need = 2 * tm * (Kp * a_itemsize + tn * out_itemsize) + fixed
        if need <= budget:
            return tm, tn
    return m_align, tn


def _pallas_matmul_bias(a, w, bias2d, *, out_dtype=jnp.float32, tm=None):
    """a: [M, Kp], w: [Kp, Np], bias2d: [1, Np] f32 -> [M, Np] out_dtype.

    Kp and Np must both be multiples of 128 (lane-dense loads and stores)."""
    M, Kp = a.shape
    Kw, Np = w.shape
    assert Kp == Kw and Kp % 128 == 0 and Np % 128 == 0

    a_itemsize = np.dtype(a.dtype).itemsize
    w_itemsize = np.dtype(w.dtype).itemsize
    out_itemsize = np.dtype(out_dtype).itemsize
    m_align = 16 if a.dtype == jnp.bfloat16 else 8

    vmem_cap, two_cores = _tpu_chip_info()
    tm_auto, tn = _choose_tiles(M, Kp, Np, a_itemsize, w_itemsize, out_itemsize,
                                m_align, vmem_cap, two_cores)
    if tm is None:
        tm = tm_auto
    grid = (pl.cdiv(M, tm), Np // tn)
    wb_const = (grid[1] == 1)               # weight/bias blocks never change
    w_bufs = 1 if wb_const else 2

    vmem_need = (2 * tm * Kp * a_itemsize           # A tiles (double buffered)
                 + 2 * tm * tn * out_itemsize       # out tiles (double buffered)
                 + w_bufs * Kp * tn * w_itemsize    # weight block(s)
                 + w_bufs * tn * 4)                 # bias block(s)
    # Leave headroom for Mosaic internal scratch: cap at 48 MiB on v7x
    # (64 MiB physical per TC), ~100 MiB on 128-MiB parts.
    hard_cap = (48 << 20) if vmem_cap <= (64 << 20) else (100 << 20)
    vmem_limit = int(min(max(vmem_need + vmem_need // 2 + (8 << 20), 32 << 20),
                         hard_cap))

    def _spec(shape, index_map, single_buffer):
        if single_buffer:
            try:
                return pl.BlockSpec(shape, index_map,
                                    pipeline_mode=pl.Buffered(1))
            except TypeError:   # older BlockSpec without pipeline_mode kwarg
                pass
        return pl.BlockSpec(shape, index_map)

    cost = pl.CostEstimate(
        flops=2 * M * Kp * Np,
        transcendentals=0,
        bytes_accessed=int(M * Kp * a_itemsize + Kp * Np * w_itemsize
                           + Np * 4 + M * Np * out_itemsize),
    )

    return pl.pallas_call(
        _matmul_bias_kernel,
        out_shape=jax.ShapeDtypeStruct((M, Np), out_dtype),
        grid_spec=pltpu.PrefetchScalarGridSpec(
            num_scalar_prefetch=0,
            grid=grid,
            in_specs=[
                pl.BlockSpec((tm, Kp), lambda i, j: (i, 0)),      # patch rows
                _spec((Kp, tn), lambda i, j: (0, j), wb_const),   # weight
                _spec((1, tn), lambda i, j: (0, j), wb_const),    # bias row
            ],
            out_specs=pl.BlockSpec((tm, tn), lambda i, j: (i, j)),
        ),
        compiler_params=pltpu.CompilerParams(
            dimension_semantics=("parallel", "parallel"),
            vmem_limit_bytes=vmem_limit,
            # Let XLA fuse the im2col reshape/transpose/cast/pad producer chain
            # into the A operand (skips the [M,K] HBM round trip when possible).
            allow_input_fusion=[True, False, False],
        ),
        cost_estimate=cost,
    )(a, w, bias2d)


# ---------------------------------------------------------------------------
# im2col (glue, plain JAX) — channel-major (C, kh, kw) flattening to match
# PyTorch's weight.reshape(out, C*kh*kw) ordering.
# ---------------------------------------------------------------------------
def _im2col(x, kh, kw, stride, padding):
    B, C, H, W = x.shape
    if padding == 0 and stride == kh and stride == kw and H % kh == 0 and W % kw == 0:
        # Non-overlapping patch embedding (the PiT/ViT case): one fused
        # reshape+transpose, no strided gathers, no data duplication.
        oh, ow = H // kh, W // kw
        p = x.reshape(B, C, oh, kh, ow, kw).transpose(0, 2, 4, 1, 3, 5)
        return p.reshape(B * oh * ow, C * kh * kw), oh, ow

    # Generic (overlapping / padded) fallback: identity-kernel conv extracts
    # patches; output features are channel-major (C, kh, kw), matching
    # weight.reshape(out_c, C*kh*kw).
    oh = (H + 2 * padding - kh) // stride + 1
    ow = (W + 2 * padding - kw) // stride + 1
    patches = lax.conv_general_dilated_patches(
        x, filter_shape=(kh, kw), window_strides=(stride, stride),
        padding=[(padding, padding), (padding, padding)],
        dimension_numbers=("NCHW", "OIHW", "NHWC"))        # [B, OH, OW, C*kh*kw]
    return patches.reshape(B * oh * ow, C * kh * kw), oh, ow


# ---------------------------------------------------------------------------
# conv_embedding.forward equivalent
# ---------------------------------------------------------------------------
def conv_embedding_forward(x, weight, bias, *, stride, padding,
                           compute_dtype=jnp.bfloat16,
                           out_dtype=jnp.float32,
                           return_tokens=False):
    """
    x:      [B, C, H, W]        (NCHW, same as PyTorch)
    weight: [out_c, C, kh, kw]  (same as nn.Conv2d.weight)
    bias:   [out_c]
    returns [B, out_c, OH, OW]  (NCHW) — or [B, OH*OW, out_c] if return_tokens.
    """
    out_c, in_c, kh, kw = weight.shape
    B = x.shape[0]

    # bf16 operands -> full-rate MXU (f32 accumulation inside the kernel).
    # Cast before im2col so the patches intermediate is half the bytes when
    # XLA cannot fuse it into the pallas_call input.
    x = x.astype(compute_dtype)
    patches, oh, ow = _im2col(x, kh, kw, stride, padding)        # [M, K]
    K = in_c * kh * kw
    w_mat = weight.reshape(out_c, K).T.astype(compute_dtype)     # [K, N]
    bias_f32 = bias.astype(jnp.float32)

    # Zero-pad K (the A-lane / contraction dim) and N (the output-lane dim) to
    # multiples of 128: full 128-lane vregs on every A load and output store;
    # numerically free.
    k_pad = (-K) % 128
    if k_pad:
        patches = jnp.pad(patches, ((0, 0), (0, k_pad)))
        w_mat = jnp.pad(w_mat, ((0, k_pad), (0, 0)))
    N = out_c
    n_pad = (-N) % 128
    if n_pad:
        w_mat = jnp.pad(w_mat, ((0, 0), (0, n_pad)))
        bias_f32 = jnp.pad(bias_f32, (0, n_pad))
    Np = N + n_pad

    y = _pallas_matmul_bias(patches, w_mat, bias_f32.reshape(1, Np),
                            out_dtype=out_dtype)                 # [M, Np]
    if n_pad:
        y = y[:, :N]
    if return_tokens:
        # Token layout skips the NHWC->NCHW HBM pass entirely.
        return y.reshape(B, oh * ow, N)
    # TODO(synk): PiT/ViT consumers flatten to tokens anyway; return_tokens=True
    # (and bf16 out_dtype) avoids this extra epilogue pass.  The Conv2d spec
    # returns NCHW, so that stays the default.
    return y.reshape(B, oh, ow, N).transpose(0, 3, 1, 2)


if __name__ == "__main__":
    # Small, PiT-like shapes: in_channels=4, out_channels=32, patch_size=4,
    # stride=4, padding=0 on a 16x16 image.
    B, C, H, W = 2, 4, 16, 16
    out_channels, patch_size, stride, padding = 32, 4, 4, 0

    key = jax.random.PRNGKey(0)
    kx, kw_, kb, k2a, k2w, k2b, k3w, k3b = jax.random.split(key, 8)
    x = jax.random.normal(kx, (B, C, H, W), dtype=jnp.float32)
    weight = 0.1 * jax.random.normal(
        kw_, (out_channels, C, patch_size, patch_size), dtype=jnp.float32)
    bias = 0.1 * jax.random.normal(kb, (out_channels,), dtype=jnp.float32)

    # 1) Patch-embedding case (non-overlapping), as in the PiT module.
    fwd = jax.jit(functools.partial(conv_embedding_forward,
                                    stride=stride, padding=padding))
    y = fwd(x, weight, bias)
    jax.block_until_ready(y)

    ref = lax.conv_general_dilated(
        x.astype(jnp.bfloat16), weight.astype(jnp.bfloat16),
        window_strides=(stride, stride),
        padding=[(padding, padding), (padding, padding)],
        dimension_numbers=("NCHW", "OIHW", "NCHW"),
        preferred_element_type=jnp.float32,
    ) + bias.reshape(1, out_channels, 1, 1)

    assert y.shape == (B, out_channels, H // stride, W // stride)
    assert y.dtype == jnp.float32
    assert jnp.allclose(y, ref, atol=2e-2, rtol=2e-2)

    # 2) Overlapping / padded conv: exercises the generic im2col fallback.
    w3 = 0.1 * jax.random.normal(k3w, (out_channels, C, 3, 3), dtype=jnp.float32)
    b3 = 0.1 * jax.random.normal(k3b, (out_channels,), dtype=jnp.float32)
    y3 = jax.jit(functools.partial(conv_embedding_forward,
                                   stride=1, padding=1))(x, w3, b3)
    ref3 = lax.conv_general_dilated(
        x.astype(jnp.bfloat16), w3.astype(jnp.bfloat16),
        window_strides=(1, 1), padding=[(1, 1), (1, 1)],
        dimension_numbers=("NCHW", "OIHW", "NCHW"),
        preferred_element_type=jnp.float32,
    ) + b3.reshape(1, out_channels, 1, 1)
    assert y3.shape == (B, out_channels, H, W)
    assert jnp.allclose(y3, ref3, atol=2e-2, rtol=2e-2)

    # 3) Masked partial last M block (M % tm != 0): exercises the Pallas
    #    OOB-row masking path that the aligned shapes above never hit.
    a2 = jax.random.normal(k2a, (40, 128), dtype=jnp.float32).astype(jnp.bfloat16)
    w2 = (0.1 * jax.random.normal(k2w, (128, 128), dtype=jnp.float32)
          ).astype(jnp.bfloat16)
    b2 = 0.1 * jax.random.normal(k2b, (128,), dtype=jnp.float32)
    y2 = jax.jit(functools.partial(_pallas_matmul_bias, tm=16))(
        a2, w2, b2.reshape(1, 128))
    jax.block_until_ready(y2)
    ref2 = jnp.dot(a2, w2, preferred_element_type=jnp.float32) + b2[None, :]
    assert y2.shape == (40, 128)
    assert jnp.allclose(y2, ref2, atol=2e-2, rtol=2e-2)

    print("KERNEL_OK")
</pallas_src>

<mosaic_0001>
module attributes {stable_mosaic.version = 11 : i64} {
  func.func @_matmul_bias_kernel(%arg0: i32, %arg1: i32, %arg2: memref<32x128xbf16, #tpu.memory_space<vmem>>, %arg3: memref<128x128xbf16, #tpu.memory_space<vmem>>, %arg4: memref<1x128xf32, #tpu.memory_space<vmem>>, %arg5: memref<32x128xf32, #tpu.memory_space<vmem>>) attributes {dimension_semantics = [#tpu.dimension_semantics<parallel>, #tpu.dimension_semantics<parallel>], iteration_bounds = array<i64: 1, 1>, scalar_prefetch = 0 : i64, scratch_operands = 0 : i64, tpu.core_type = #tpu.core_type<tc>, window_params = [{transform_indices = @transform_0, window_bounds = array<i64: 32, 128>}, {pipeline_mode = #tpu.pipeline_mode<synchronous>, transform_indices = @transform_1, window_bounds = array<i64: 128, 128>}, {pipeline_mode = #tpu.pipeline_mode<synchronous>, transform_indices = @transform_2, window_bounds = array<i64: 1, 128>}, {transform_indices = @transform_3, window_bounds = array<i64: 32, 128>}]} {
    %c0 = arith.constant 0 : index
    %c0_0 = arith.constant 0 : index
    %0 = vector.load %arg2[%c0, %c0_0] : memref<32x128xbf16, #tpu.memory_space<vmem>>, vector<32x128xbf16>
    %c0_1 = arith.constant 0 : index
    %c0_2 = arith.constant 0 : index
    %1 = vector.load %arg3[%c0_1, %c0_2] : memref<128x128xbf16, #tpu.memory_space<vmem>>, vector<128x128xbf16>
    %cst = arith.constant dense<0.000000e+00> : vector<32x128xf32>
    %2 = tpu.matmul %0, %1, %cst {dimension_numbers = #tpu.dot_dimension_numbers<[1], [0], [0], [1], [0, 0, 1, 1], [], []>} : vector<32x128xbf16>, vector<128x128xbf16>, vector<32x128xf32> -> vector<32x128xf32>
    %c0_3 = arith.constant 0 : index
    %c0_4 = arith.constant 0 : index
    %3 = vector.load %arg4[%c0_3, %c0_4] : memref<1x128xf32, #tpu.memory_space<vmem>>, vector<1x128xf32>
    %4 = vector.broadcast %3 : vector<1x128xf32> to vector<32x128xf32>
    %5 = arith.addf %2, %4 : vector<32x128xf32>
    %c0_5 = arith.constant 0 : index
    %c0_6 = arith.constant 0 : index
    %6 = vector.load %arg5[%c0_5, %c0_6] : memref<32x128xf32, #tpu.memory_space<vmem>>, vector<32x128xf32>
    tpu.vector_store %arg5[%c0_5, %c0_6], %5 {strides = array<i32>} : memref<32x128xf32, #tpu.memory_space<vmem>>, vector<32x128xf32>,
    return
  }
  func.func @transform_0(%arg0: i32, %arg1: i32) -> (i32, i32) {
    %c0_i32 = arith.constant 0 : i32
    %c0_i32_0 = arith.constant 0 : i32
    return %arg0, %c0_i32 : i32, i32
  }
  func.func @transform_1(%arg0: i32, %arg1: i32) -> (i32, i32) {
    %c0_i32 = arith.constant 0 : i32
    %c0_i32_0 = arith.constant 0 : i32
    return %c0_i32, %arg1 : i32, i32
  }
  func.func @transform_2(%arg0: i32, %arg1: i32) -> (i32, i32) {
    %c0_i32 = arith.constant 0 : i32
    %c0_i32_0 = arith.constant 0 : i32
    return %c0_i32, %arg1 : i32, i32
  }
  func.func @transform_3(%arg0: i32, %arg1: i32) -> (i32, i32) {
    %c0_i32 = arith.constant 0 : i32
    return %arg0, %arg1 : i32, i32
  }
}

</mosaic_0001>

<bundles_post_ra>
// kernel: conv_embedding_forward.2
= control target key start
LH: loop header
LB: loop body
LE: loop exit
PB: predicated region body
PF: predicated region fallthrough
CT: control target
= control target key end

     0   :  { %s423_s0 = inlined_call_operand.vmem [shape: bf16[128,128], index: 0, kind: input, shape index: {}]   ;;  %s424_s1 = inlined_call_operand.vmem [shape: f32[1,128], index: 1, kind: input, shape index: {}]   ;;  %s425_s2 = inlined_call_operand.vmem [shape: bf16[32,64], index: 2, kind: input, shape index: {}]   ;;  %s426_s3 = inlined_call_operand.<no memory space> [shape: bf16[], index: 3, kind: input, shape index: {}]   ;;  %s427_s4 = inlined_call_operand.hbm [shape: f32[32,128], index: 4, kind: output, shape index: {}]  }
   0x1   :  { %v9_v0 = vstv %s426_s3 }
   0x2   :  { %v10_v1 = vunpack.i.l.bf16 %v9_v0 }
   0x3   :  { %v312_v2 = vld [vmem:[%s423_s0] sm:$0xff]   ;;  %v33_v3 = vlaneseq  ;;  %v313_v4 = vld [vmem:[%s423_s0 + $0x8] sm:$0xff]   ;;  %v314_v5 = vld [vmem:[%s423_s0 + $0x10] sm:$0xff]  }
   0x4   :  { %288 = vmatprep.subr.bf16.mxu0 %v312_v2  ;;  %v315_v7 = vld [vmem:[%s423_s0 + $0x18] sm:$0xff]   ;;  %v30_v8 = vld [vmem:[%s425_s2] sm:$0xff]   ;;  %v265_v9 = vld [vmem:[%s425_s2 + $0x8] sm:$0xff]  }
   0x5   :  { %289 = vmatpush3.bf16.msra.mxu0 %v312_v2  ;;  %v34_v6 = vand.u32 127, %v33_v3 }
   0x6   :  { %290 = vmatprep.subr.bf16.mxu0 %v313_v4 }
   0x7   :  { %vm36_vm0 = vcmp.lt.s32.totalorder %v34_v6, 64 }
   0x9   :  { %291 = vmatpush3.bf16.msra.mxu0 %v313_v4 }
   0xa   :  { %292 = vmatprep.subr.bf16.mxu0 %v314_v5 }
   0xb   :  { %14 = vsyncpa [#allocation8], 0  ;;  %v31_v10 = vunpack.c.l.bf16 %v30_v8  ;;  %v52_v11 = vunpack.c.h.bf16 %v30_v8  ;;  %v74_v12 = vunpack.c.l.bf16 %v265_v9  ;;  %v96_v13 = vunpack.c.h.bf16 %v265_v9  ;;  %v316_v18 = vld [vmem:[%s423_s0 + $0x20] sm:$0xff]   ;;  %v317_v24 = vld [vmem:[%s423_s0 + $0x28] sm:$0xff]   ;;  %s347_s11 = smov [#allocation7]  }
   0xc   :  { %v346_v19 = vmov 0.0   ;;  %v318_v25 = vld [vmem:[%s423_s0 + $0x30] sm:$0xff]   ;;  %v319_v27 = vld [vmem:[%s423_s0 + $0x38] sm:$0xff]   ;;  %v267_v29 = vld [vmem:[%s424_s1] ss:$0 sm:$0xff]  ;;  %s253_s12 = sshll.u32 %s347_s11, 4  ;;  %s254_s12 = int_to_ptr.vmem [resolvable:$true] %s253_s12 }
   0xd   :  { %293 = vmatpush3.bf16.msra.mxu0 %v314_v5  ;;  %v37_v14 = vsel %vm36_vm0, %v31_v10, %v10_v1  ;;  %v58_v15 = vsel %vm36_vm0, %v52_v11, %v10_v1  ;;  %v80_v16 = vsel %vm36_vm0, %v74_v12, %v10_v1  ;;  %v102_v17 = vsel %vm36_vm0, %v96_v13, %v10_v1  ;;  %s322_s0 = scalar_lea.vmem %s254_s12, 512  ;;  %p327_p1 = scmp.lt.s32.totalorder %s254_s12, %s254_s12 }
   0xe   :  { %294 = vmatprep.subr.bf16.mxu0 %v315_v7  ;;  %v38_v20 = vpack.c.bf16 %v346_v19, %v37_v14  ;;  %v60_v21 = vpack.c.bf16 %v346_v19, %v58_v15  ;;  %v82_v22 = vpack.c.bf16 %v346_v19, %v80_v16  ;;  %v104_v23 = vpack.c.bf16 %v346_v19, %v102_v17  ;;  %p323_p0 = scmp.ne.s32.totalorder %s254_s12, %s322_s0  ;;  %p328_p2 = scmp.lt.s32.totalorder %s322_s0, %s322_s0 }
  0x10   :  { %40 = vst [vmem:[#allocation9] sm:$0xf] %v38_v20  ;;  %62 = vst [vmem:[#allocation9 + $0x4] sm:$0xf] %v60_v21  ;;  %p329_p3 = por %p328_p2, %p327_p1 }
  0x11   :  { %84 = vst [vmem:[#allocation9 + $0x8] sm:$0xf] %v82_v22  ;;  %106 = vst [vmem:[#allocation9 + $0xc] sm:$0xf] %v104_v23  ;;  %295 = vmatpush3.bf16.msra.mxu0 %v315_v7 }
  0x12   :  { %296 = vmatprep.subr.bf16.mxu0 %v316_v18  ;;  %p330_p4 = pnand %p329_p3, %p323_p0 }
  0x15   :  { %297 = vmatpush3.bf16.msra.mxu0 %v316_v18 }
  0x16   :  { %298 = vmatprep.subr.bf16.mxu0 %v317_v24 }
  0x17   :  { %v320_v26 = vld [vmem:[#allocation9] sm:$0xff]  }
  0x18   :  { %304 = vmatprep.mubr.bf16.mxu0 %v320_v26  ;;  %v321_v28 = vld [vmem:[#allocation9 + $0x8] sm:$0xff]  }
  0x19   :  { %299 = vmatpush3.bf16.msra.mxu0 %v317_v24 }
  0x1a   :  { %300 = vmatprep.subr.bf16.mxu0 %v318_v25 }
  0x1d   :  { %301 = vmatpush3.bf16.msra.mxu0 %v318_v25 }
  0x1e   :  { %302 = vmatprep.subr.bf16.mxu0 %v319_v27 }
  0x21   :  { %303 = vmatpush3.bf16.msra.mxu0 %v319_v27 }
  0x24   :  { %305 = vmatmul.mubr.bf16.vlgmr.msra.gmra.mrb[0].mxu0 %v321_v28 }
  0xf7   :  { %v306_v30 = vpop.f32.mrb[0].mxu0 }
  0xf8   :  { %v238_v31 = vadd.f32 %v306_v30, %v267_v29  ;;  %v229_v32 = vpop.f32.mrb[1].mxu0 }
  0xf9   :  { %v230_v33 = vadd.f32 %v267_v29, %v229_v32  ;;  %v307_v34 = vpop.f32.mrb[2].mxu0 }
  0xfa   :  { %246 = vst [vmem:[#allocation7 + $0x10] sm:$0xff] %v238_v31  ;;  %v241_v35 = vadd.f32 %v307_v34, %v267_v29  ;;  %v232_v36 = vpop.f32.mrb[3].mxu0 }
  0xfb   :  { %244 = vst [vmem:[#allocation7] sm:$0xff] %v230_v33  ;;  %v233_v37 = vadd.f32 %v267_v29, %v232_v36 }
  0xfc   :  { %247 = vst [vmem:[#allocation7 + $0x18] sm:$0xff] %v241_v35 }
  0xfd   :  { %245 = vst [vmem:[#allocation7 + $0x8] sm:$0xff] %v233_v37 }
  0xfe   :  { %333 = shalt.err (!%p330_p4)
}
  0xff   :  { %s334_s14 = scalar_lea.hbm %s427_s4, 512 }
 0x100   :  { %p335_p5 = scmp.ne.s32.totalorder %s427_s4, %s334_s14  ;;  %p338_p6 = scmp.lt.u32.totalorder %s334_s14, %s427_s4 }
 0x102   :  { %p340_p7 = pnand %p338_p6, %p335_p5 }
 0x104   :  { %343 = shalt.err (!%p340_p7)
}
 0x105   :  { %s348_s19 = smov 128   ;;  %s349_s20 = smov 8  }
 0x106   :  { %259 = dma.vmem_to_hbm [thread:$0]  %s254_s12, 512, %s427_s4, [#allocation8], %s348_s19, %s348_s19, %s349_s20  }
 0x107   :  { %344 = dma.done.wait [#allocation8], 512  }
 0x108   :  { %345 = vsyncadd [#allocation8], 4294966784 }
 0x109   :  { %263 = vsyncpa [#allocation8], 1 }

</bundles_post_ra>
